<compile_context>
chip_gen: v5e
topology: v5e:2x2
jax: 0.10.0
libtpu: 0.0.40
codegen_flags: <defaults>
</compile_context>

<pallas_src>
import math
from functools import partial

import jax
import jax.numpy as jnp
from jax.experimental import pallas as pl
from jax.experimental.pallas import tpu as pltpu


_VMEM_LIMIT_BYTES = 48 * 1024 * 1024  # explicit scoped-VMEM budget (< v7x 64 MiB physical)


# ----------------------------------------------------------------------------
# Helpers
# ----------------------------------------------------------------------------
def _round_up(n, m):
    return ((n + m - 1) // m) * m


def _pad_axis(x, axis, new_size):
    pad = new_size - x.shape[axis]
    if pad == 0:
        return x
    widths = [(0, 0)] * x.ndim
    widths[axis] = (0, pad)
    return jnp.pad(x, widths)


def _seq_tile(n, target):
    """Whole array if it already fits in one tile, else a 128-multiple <= target."""
    if n <= target:
        return n
    return max(128, (target // 128) * 128)


_BUFFERED_OK = None


def _buffered_supported():
    """Probe once whether pipeline_mode=pl.Buffered(1) lowers/runs on this backend."""
    global _BUFFERED_OK
    if _BUFFERED_OK is None:
        try:
            def _probe_kernel(x_ref, w_ref, o_ref):
                o_ref[...] = x_ref[...] + w_ref[...]

            f = pl.pallas_call(
                _probe_kernel,
                out_shape=jax.ShapeDtypeStruct((8, 128), jnp.float32),
                grid_spec=pltpu.PrefetchScalarGridSpec(
                    num_scalar_prefetch=0,
                    grid=(1,),
                    in_specs=[
                        pl.BlockSpec((8, 128), lambda i: (0, 0)),
                        pl.BlockSpec((8, 128), lambda i: (0, 0),
                                     pipeline_mode=pl.Buffered(buffer_count=1)),
                    ],
                    out_specs=pl.BlockSpec((8, 128), lambda i: (0, 0)),
                ),
            )
            z = jnp.zeros((8, 128), jnp.float32)
            jax.block_until_ready(f(z, z))
            _BUFFERED_OK = True
        except Exception:
            _BUFFERED_OK = False
    return _BUFFERED_OK


def _invariant_spec(block_shape, index_map):
    """BlockSpec for a grid-invariant operand; single-buffered when supported."""
    if _buffered_supported():
        return pl.BlockSpec(block_shape, index_map,
                            pipeline_mode=pl.Buffered(buffer_count=1))
    return pl.BlockSpec(block_shape, index_map)


# ----------------------------------------------------------------------------
# Linear kernels (row-tiled, software-pipelined)
# ----------------------------------------------------------------------------
def _linear_kernel(x_ref, w_ref, b_ref, o_ref):
    # x: [tm, D_in], w: [D_in, D_out], b: [1, D_out]
    acc = jnp.dot(x_ref[...], w_ref[...], preferred_element_type=jnp.float32)
    o_ref[...] = (acc + b_ref[...]).astype(o_ref.dtype)


def _qkv_linear_kernel(x_ref, w_ref, b_ref, q_ref, k_ref, v_ref):
    # Fused projection: three dots against lane-aligned weight column slices so
    # the live f32 intermediate is [tm, D] (not [tm, 3D]).
    d = q_ref.shape[-1]
    x = x_ref[...]
    for idx, out in enumerate((q_ref, k_ref, v_ref)):
        lo = idx * d
        acc = jnp.dot(x, w_ref[:, lo:lo + d], preferred_element_type=jnp.float32)
        out[...] = (acc + b_ref[:, lo:lo + d]).astype(out.dtype)


def pallas_linear(x2d, w, b, *, tm=256):
    """y = x2d @ w + b.  x2d: [N, D_in], w: [D_in, D_out], b: [D_out]."""
    N, Din = x2d.shape
    Dout = w.shape[1]
    tm = _seq_tile(N, tm)
    Np = _round_up(N, tm)
    xp = _pad_axis(x2d, 0, Np)          # padded rows sliced off after the call
    out = pl.pallas_call(
        _linear_kernel,
        out_shape=jax.ShapeDtypeStruct((Np, Dout), x2d.dtype),
        grid_spec=pltpu.PrefetchScalarGridSpec(
            num_scalar_prefetch=0,
            grid=(Np // tm,),
            in_specs=[
                pl.BlockSpec((tm, Din), lambda i: (i, 0)),
                _invariant_spec((Din, Dout), lambda i: (0, 0)),
                _invariant_spec((1, Dout), lambda i: (0, 0)),
            ],
            out_specs=pl.BlockSpec((tm, Dout), lambda i: (i, 0)),
        ),
        compiler_params=pltpu.CompilerParams(
            dimension_semantics=("parallel",),
            vmem_limit_bytes=_VMEM_LIMIT_BYTES),
    )(xp, w, b.reshape(1, Dout))
    return out[:N] if Np != N else out


def pallas_qkv_linear(x2d, w_qkv, b_qkv, *, tm=256):
    """Fused QKV projection (self-attention): x2d: [N, D], w_qkv: [D, 3D]."""
    N, D = x2d.shape
    tm = _seq_tile(N, tm)
    Np = _round_up(N, tm)
    xp = _pad_axis(x2d, 0, Np)
    out_sd = jax.ShapeDtypeStruct((Np, D), x2d.dtype)
    q, k, v = pl.pallas_call(
        _qkv_linear_kernel,
        out_shape=(out_sd, out_sd, out_sd),
        grid_spec=pltpu.PrefetchScalarGridSpec(
            num_scalar_prefetch=0,
            grid=(Np // tm,),
            in_specs=[
                pl.BlockSpec((tm, D), lambda i: (i, 0)),
                _invariant_spec((D, 3 * D), lambda i: (0, 0)),
                _invariant_spec((1, 3 * D), lambda i: (0, 0)),
            ],
            out_specs=[
                pl.BlockSpec((tm, D), lambda i: (i, 0)),
                pl.BlockSpec((tm, D), lambda i: (i, 0)),
                pl.BlockSpec((tm, D), lambda i: (i, 0)),
            ],
        ),
        compiler_params=pltpu.CompilerParams(
            dimension_semantics=("parallel",),
            vmem_limit_bytes=_VMEM_LIMIT_BYTES),
    )(xp, w_qkv, b_qkv.reshape(1, 3 * D))
    if Np != N:
        q, k, v = q[:N], k[:N], v[:N]
    return q, k, v


# ----------------------------------------------------------------------------
# Attention kernel: Q- and KV-tiled online softmax, all heads per grid step
# ----------------------------------------------------------------------------
def _attention_kernel(*refs, h, causal, has_mask, kv_len):
    if has_mask:
        q_ref, k_ref, v_ref, mask_ref, o_ref, m_sc, l_sc, acc_sc = refs
    else:
        q_ref, k_ref, v_ref, o_ref, m_sc, l_sc, acc_sc = refs
        mask_ref = None

    qi = pl.program_id(1)
    kv = pl.program_id(2)

    tq, D = q_ref.shape[1], q_ref.shape[2]
    tk = k_ref.shape[1]
    dk = D // h

    @pl.when(kv == 0)
    def _():
        m_sc[...] = jnp.full_like(m_sc, -jnp.inf)
        l_sc[...] = jnp.zeros_like(l_sc)
        acc_sc[...] = jnp.zeros_like(acc_sc)

    def compute():
        # Validity mask for this (q tile, kv tile); None => attend everywhere.
        # Masked scores use a finite -1e9 (matches PyTorch masked_fill), so the
        # running max is finite after the first processed tile (no NaN in alpha).
        valid = None
        if causal:
            row = jax.lax.broadcasted_iota(jnp.int32, (tq, tk), 0) + qi * tq
            col = jax.lax.broadcasted_iota(jnp.int32, (tq, tk), 1) + kv * tk
            valid = row >= col
        if kv_len is not None:  # keys beyond kv_len are padding
            col = jax.lax.broadcasted_iota(jnp.int32, (tq, tk), 1) + kv * tk
            in_range = col < kv_len
            valid = in_range if valid is None else (valid & in_range)
        if has_mask:
            mvalid = mask_ref[0] != 0        # int8 mask tile [tq, tk]
            valid = mvalid if valid is None else (valid & mvalid)

        # All heads of this (batch, q-tile) handled here; HBM traffic stays
        # lane-dense and no head transpose ever leaves the kernel.
        # TODO(synk): at d_k < 128 the MXU contraction is underfilled and the
        # per-head lane slices cost extra copies; a head-major K/V layout from
        # the projection (or d_k >= 128 configs) would remove that.
        for head in range(h):
            lo = head * dk
            qh = q_ref[0, :, lo:lo + dk]     # [tq, dk]
            kh = k_ref[0, :, lo:lo + dk]     # [tk, dk]
            vh = v_ref[0, :, lo:lo + dk]     # [tk, dk]

            # QK^T: contract last dims (no explicit transpose), f32 accumulate.
            # 1/sqrt(d_k) is already folded into Wq, so no per-score scale here.
            s = jax.lax.dot_general(
                qh, kh, (((1,), (1,)), ((), ())),
                preferred_element_type=jnp.float32)          # [tq, tk]
            if valid is not None:
                s = jnp.where(valid, s, jnp.float32(-1e9))

            m_prev = m_sc[head]                               # [tq, 1]
            m_new = jnp.maximum(m_prev, s.max(axis=-1, keepdims=True))
            alpha = jnp.exp(m_prev - m_new)
            p = jnp.exp(s - m_new)                            # [tq, tk] f32
            l_sc[head] = alpha * l_sc[head] + p.sum(axis=-1, keepdims=True)
            pv = jax.lax.dot_general(
                p.astype(vh.dtype), vh, (((1,), (0,)), ((), ())),
                preferred_element_type=jnp.float32)           # [tq, dk]
            acc_sc[head] = alpha * acc_sc[head] + pv
            m_sc[head] = m_new

    if causal:
        # Skip KV tiles fully above the causal diagonal for this Q tile.
        pl.when(kv * tk <= qi * tq + (tq - 1))(compute)
    else:
        compute()

    @pl.when(kv == pl.num_programs(2) - 1)
    def _():
        # Normalize and write each head directly into its lane range (no concat
        # temporary); approx reciprocal runs on the EUP slot.
        for head in range(h):
            lo = head * dk
            inv = pl.reciprocal(l_sc[head], approx=True)
            o_ref[0, :, lo:lo + dk] = (acc_sc[head] * inv).astype(o_ref.dtype)


def pallas_attention(q, k, v, mask=None, *, h, causal=False, tq=256, tk=512):
    """Scaled-dot-product attention; heads folded along the last dim.

    q: [B, Sq, H*dk], k/v: [B, Sk, H*dk].  mask: optional [B, Sq, Sk] or
    [B, 1, Sk] (nonzero = attend); it is combined with the in-kernel causal
    mask when causal=True.  The 1/sqrt(d_k) scale must already be folded into
    the query projection (see prepare_params).  Returns [B, Sq, H*dk].
    """
    B, Sq, D = q.shape
    Sk = k.shape[1]
    dk = D // h

    # Tile defaults are 128/256 multiples; retune per generation
    # (v5e: tq/tk~128-256, v6e: 256-multiples, v7x: smaller VMEM budget).
    tq = _seq_tile(Sq, tq)
    tk = _seq_tile(Sk, tk)
    Sqp = _round_up(Sq, tq)
    Skp = _round_up(Sk, tk)
    nq, nkv = Sqp // tq, Skp // tk

    qp = _pad_axis(q, 1, Sqp)
    kp = _pad_axis(k, 1, Skp)
    vp = _pad_axis(v, 1, Skp)
    kv_len = Sk if Skp != Sk else None      # mask padded key columns in-kernel

    has_mask = mask is not None
    args = [qp, kp, vp]
    in_specs = [
        pl.BlockSpec((1, tq, D), lambda b, i, j: (b, i, 0)),
        pl.BlockSpec((1, tk, D), lambda b, i, j: (b, j, 0)),
        pl.BlockSpec((1, tk, D), lambda b, i, j: (b, j, 0)),
    ]
    mask_bytes = 0
    if has_mask:
        m = mask
        if m.ndim == 2:
            m = m[None]
        if m.shape[1] == 1:
            # TODO(synk): a [B, Sk] key-validity vector fast path would avoid
            # materializing the dense broadcasted mask entirely.
            m = jnp.broadcast_to(m, (B, Sq, Sk))
        m = _pad_axis(_pad_axis(m.astype(jnp.int8), 1, Sqp), 2, Skp)
        args.append(m)
        in_specs.append(pl.BlockSpec((1, tq, tk), lambda b, i, j: (b, i, j)))
        mask_bytes = B * Sqp * Skp          # int8

    kern = partial(_attention_kernel, h=h, causal=causal,
                   has_mask=has_mask, kv_len=kv_len)

    flops = 4 * B * Sqp * Skp * D           # QK^T + PV over all heads
    trans = B * h * Sqp * Skp
    if causal:
        flops //= 2
        trans //= 2
    bytes_accessed = 4 * int(q.size + k.size + v.size + B * Sqp * D) + mask_bytes

    out = pl.pallas_call(
        kern,
        out_shape=jax.ShapeDtypeStruct((B, Sqp, D), q.dtype),
        grid_spec=pltpu.PrefetchScalarGridSpec(
            num_scalar_prefetch=0,
            grid=(B, nq, nkv),
            in_specs=in_specs,
            out_specs=pl.BlockSpec((1, tq, D), lambda b, i, j: (b, i, 0)),
            scratch_shapes=[
                pltpu.VMEM((h, tq, 1), jnp.float32),    # running max
                pltpu.VMEM((h, tq, 1), jnp.float32),    # running denom
                pltpu.VMEM((h, tq, dk), jnp.float32),   # running PV accum
            ],
        ),
        compiler_params=pltpu.CompilerParams(
            dimension_semantics=("parallel", "parallel", "arbitrary"),
            vmem_limit_bytes=_VMEM_LIMIT_BYTES),
        cost_estimate=pl.CostEstimate(
            flops=int(flops),
            transcendentals=int(trans),
            bytes_accessed=int(bytes_accessed),
        ),
    )(*args)
    return out[:, :Sq] if Sqp != Sq else out


# ----------------------------------------------------------------------------
# Parameter prep (one-time) + full module forward
# ----------------------------------------------------------------------------
def prepare_params(raw, h):
    """Fold 1/sqrt(d_k) into Wq/bq and build the fused [Wq|Wk|Wv] once."""
    D = raw["wq"].shape[0]
    d_k = D // h
    scale = 1.0 / math.sqrt(d_k)
    wq = raw["wq"] * scale
    bq = raw["bq"] * scale
    return {
        "wq": wq, "bq": bq,
        "wk": raw["wk"], "bk": raw["bk"],
        "wv": raw["wv"], "bv": raw["bv"],
        "wo": raw["wo"], "bo": raw["bo"],
        "w_qkv": jnp.concatenate([wq, raw["wk"], raw["wv"]], axis=1),
        "b_qkv": jnp.concatenate([bq, raw["bk"], raw["bv"]]),
    }


def multi_headed_attention(prepared, query, key, value, mask=None, *, h,
                           causal=False, attn_tq=256, attn_tk=512):
    """Forward pass matching MultiHeadedAttention.forward (eval mode)."""
    B, Sq, D = query.shape
    Sk = key.shape[1]

    if (query is key) and (key is value):
        # Self-attention: one fused QKV matmul (x read once, 3D-wide MXU pass).
        q2d, k2d, v2d = pallas_qkv_linear(query.reshape(B * Sq, D),
                                          prepared["w_qkv"], prepared["b_qkv"])
        q3 = q2d.reshape(B, Sq, D)
        k3 = k2d.reshape(B, Sq, D)
        v3 = v2d.reshape(B, Sq, D)
    else:
        # Cross-attention (distinct inputs): separate tiled projections.
        q3 = pallas_linear(query.reshape(B * Sq, D),
                           prepared["wq"], prepared["bq"]).reshape(B, Sq, D)
        k3 = pallas_linear(key.reshape(B * Sk, D),
                           prepared["wk"], prepared["bk"]).reshape(B, Sk, D)
        v3 = pallas_linear(value.reshape(B * Sk, D),
                           prepared["wv"], prepared["bv"]).reshape(B, Sk, D)

    # Head split/merge happens inside the attention kernel; no HBM transposes.
    x = pallas_attention(q3, k3, v3, mask=mask, h=h, causal=causal,
                         tq=attn_tq, tk=attn_tk)
    out = pallas_linear(x.reshape(B * Sq, D), prepared["wo"], prepared["bo"])
    return out.reshape(B, Sq, D)


# ----------------------------------------------------------------------------
# Pure-JAX reference (for correctness check; uses the raw, unscaled params)
# ----------------------------------------------------------------------------
def reference_mha(params, query, key, value, mask, *, h):
    B, Sq, D = query.shape
    Sk = key.shape[1]
    d_k = D // h

    def proj(x, w, b):
        y = x @ w + b
        return y.reshape(B, -1, h, d_k).transpose(0, 2, 1, 3)

    q = proj(query, params["wq"], params["bq"])
    k = proj(key, params["wk"], params["bk"])
    v = proj(value, params["wv"], params["bv"])
    scores = jnp.einsum("bhqd,bhkd->bhqk", q, k) / math.sqrt(d_k)
    if mask is not None:
        scores = jnp.where(mask.reshape(B, 1, Sq, Sk) == 0, -1e9, scores)
    p = jax.nn.softmax(scores, axis=-1)
    x = jnp.einsum("bhqk,bhkd->bhqd", p, v)
    x = x.transpose(0, 2, 1, 3).reshape(B, Sq, D)
    return x @ params["wo"] + params["bo"]


# ----------------------------------------------------------------------------
# Main
# ----------------------------------------------------------------------------
if __name__ == "__main__":
    B, S, D, H = 2, 8, 32, 4   # batch, seq, d_model, heads (d_k = 8)

    key0 = jax.random.PRNGKey(0)
    keys = jax.random.split(key0, 14)
    bound = 1.0 / math.sqrt(D)  # PyTorch nn.Linear default init range

    raw = {
        "wq": jax.random.uniform(keys[0], (D, D), jnp.float32, -bound, bound),
        "bq": jax.random.uniform(keys[1], (D,), jnp.float32, -bound, bound),
        "wk": jax.random.uniform(keys[2], (D, D), jnp.float32, -bound, bound),
        "bk": jax.random.uniform(keys[3], (D,), jnp.float32, -bound, bound),
        "wv": jax.random.uniform(keys[4], (D, D), jnp.float32, -bound, bound),
        "bv": jax.random.uniform(keys[5], (D,), jnp.float32, -bound, bound),
        "wo": jax.random.uniform(keys[6], (D, D), jnp.float32, -bound, bound),
        "bo": jax.random.uniform(keys[7], (D,), jnp.float32, -bound, bound),
    }
    prepared = prepare_params(raw, H)

    x = jax.random.normal(keys[8], (B, S, D), jnp.float32)
    causal_mask = jnp.broadcast_to(jnp.tril(jnp.ones((S, S), jnp.float32)),
                                   (B, S, S))

    # approx reciprocal (EUP) in the finalize => slightly loosened tolerance.
    TOL = dict(atol=2e-3, rtol=2e-3)

    # 1) Decoder self-attention: fused QKV + in-kernel causal mask (no mask DMA).
    out1 = jax.block_until_ready(
        multi_headed_attention(prepared, x, x, x, mask=None, h=H, causal=True))
    ref1 = reference_mha(raw, x, x, x, causal_mask, h=H)
    assert out1.shape == (B, S, D)
    assert jnp.allclose(out1, ref1, **TOL), "causal path mismatch"

    # 2) Self-attention with an explicit (int8) mask DMA'd per tile.
    out2 = jax.block_until_ready(
        multi_headed_attention(prepared, x, x, x, mask=causal_mask, h=H))
    assert jnp.allclose(out2, ref1, **TOL), "mask path mismatch"

    # 3) Decoder-style combined mask: causal AND key-padding mask together.
    pad_mask = jnp.ones((B, 1, S), jnp.float32).at[0, 0, S - 2:].set(0.0)
    out3 = jax.block_until_ready(
        multi_headed_attention(prepared, x, x, x, mask=pad_mask, h=H,
                               causal=True))
    ref3 = reference_mha(raw, x, x, x, causal_mask * pad_mask, h=H)
    assert jnp.allclose(out3, ref3, **TOL), "causal+padding mask mismatch"

    # 4) Cross-attention: distinct q/k/v inputs, longer KV sequence, no mask.
    Sk = 16
    q_in = jax.random.normal(keys[9], (B, S, D), jnp.float32)
    k_in = jax.random.normal(keys[10], (B, Sk, D), jnp.float32)
    v_in = jax.random.normal(keys[11], (B, Sk, D), jnp.float32)
    out4 = jax.block_until_ready(
        multi_headed_attention(prepared, q_in, k_in, v_in, mask=None, h=H))
    ref4 = reference_mha(raw, q_in, k_in, v_in, None, h=H)
    assert jnp.allclose(out4, ref4, **TOL), "cross-attn mismatch"

    # 5) Tiled + padded path: Sq=Sk=160 with 128-tiles -> 2x2 grid, causal
    #    tile skipping and in-kernel masking of the padded key tail.
    S5 = 160
    x5 = jax.random.normal(keys[12], (1, S5, D), jnp.float32)
    out5 = jax.block_until_ready(
        multi_headed_attention(prepared, x5, x5, x5, mask=None, h=H,
                               causal=True, attn_tq=128, attn_tk=128))
    ref5 = reference_mha(raw, x5, x5, x5,
                         jnp.tril(jnp.ones((S5, S5), jnp.float32))[None], h=H)
    assert out5.shape == (1, S5, D)
    assert jnp.allclose(out5, ref5, **TOL), "tiled/padded causal mismatch"

    print("KERNEL_OK")
</pallas_src>

<mosaic_0001>
module attributes {stable_mosaic.version = 11 : i64} {
  func.func @_probe_kernel(%arg0: i32, %arg1: memref<8x128xf32, #tpu.memory_space<vmem>>, %arg2: memref<8x128xf32, #tpu.memory_space<vmem>>, %arg3: memref<8x128xf32, #tpu.memory_space<vmem>>) attributes {dimension_semantics = [#tpu.dimension_semantics<arbitrary>], iteration_bounds = array<i64: 1>, scalar_prefetch = 0 : i64, scratch_operands = 0 : i64, tpu.core_type = #tpu.core_type<tc>, window_params = [{pipeline_mode = #tpu.pipeline_mode<synchronous>, transform_indices = @transform_0, window_bounds = array<i64: 8, 128>}, {pipeline_mode = #tpu.pipeline_mode<synchronous>, transform_indices = @transform_1, window_bounds = array<i64: 8, 128>}, {pipeline_mode = #tpu.pipeline_mode<synchronous>, transform_indices = @transform_2, window_bounds = array<i64: 8, 128>}]} {
    %c0 = arith.constant 0 : index
    %c0_0 = arith.constant 0 : index
    %0 = vector.load %arg1[%c0, %c0_0] : memref<8x128xf32, #tpu.memory_space<vmem>>, vector<8x128xf32>
    %c0_1 = arith.constant 0 : index
    %c0_2 = arith.constant 0 : index
    %1 = vector.load %arg2[%c0_1, %c0_2] : memref<8x128xf32, #tpu.memory_space<vmem>>, vector<8x128xf32>
    %2 = arith.addf %0, %1 : vector<8x128xf32>
    %c0_3 = arith.constant 0 : index
    %c0_4 = arith.constant 0 : index
    %3 = vector.load %arg3[%c0_3, %c0_4] : memref<8x128xf32, #tpu.memory_space<vmem>>, vector<8x128xf32>
    tpu.vector_store %arg3[%c0_3, %c0_4], %2 {strides = array<i32>} : memref<8x128xf32, #tpu.memory_space<vmem>>, vector<8x128xf32>,
    return
  }
  func.func @transform_0(%arg0: i32) -> (i32, i32) {
    %c0_i32 = arith.constant 0 : i32
    %c0_i32_0 = arith.constant 0 : i32
    %c0_i32_1 = arith.constant 0 : i32
    return %c0_i32, %c0_i32_0 : i32, i32
  }
  func.func @transform_1(%arg0: i32) -> (i32, i32) {
    %c0_i32 = arith.constant 0 : i32
    %c0_i32_0 = arith.constant 0 : i32
    %c0_i32_1 = arith.constant 0 : i32
    return %c0_i32, %c0_i32_0 : i32, i32
  }
  func.func @transform_2(%arg0: i32) -> (i32, i32) {
    %c0_i32 = arith.constant 0 : i32
    %c0_i32_0 = arith.constant 0 : i32
    %c0_i32_1 = arith.constant 0 : i32
    return %c0_i32, %c0_i32_0 : i32, i32
  }
}

module attributes {stable_mosaic.version = 11 : i64} {
  func.func @_qkv_linear_kernel(%arg0: i32, %arg1: memref<16x32xf32, #tpu.memory_space<vmem>>, %arg2: memref<32x96xf32, #tpu.memory_space<vmem>>, %arg3: memref<1x96xf32, #tpu.memory_space<vmem>>, %arg4: memref<16x32xf32, #tpu.memory_space<vmem>>, %arg5: memref<16x32xf32, #tpu.memory_space<vmem>>, %arg6: memref<16x32xf32, #tpu.memory_space<vmem>>) attributes {dimension_semantics = [#tpu.dimension_semantics<parallel>], iteration_bounds = array<i64: 1>, scalar_prefetch = 0 : i64, scratch_operands = 0 : i64, tpu.core_type = #tpu.core_type<tc>, window_params = [{transform_indices = @transform_0, window_bounds = array<i64: 16, 32>}, {pipeline_mode = #tpu.pipeline_mode<synchronous>, transform_indices = @transform_1, window_bounds = array<i64: 32, 96>}, {pipeline_mode = #tpu.pipeline_mode<synchronous>, transform_indices = @transform_2, window_bounds = array<i64: 1, 96>}, {transform_indices = @transform_3, window_bounds = array<i64: 16, 32>}, {transform_indices = @transform_4, window_bounds = array<i64: 16, 32>}, {transform_indices = @transform_5, window_bounds = array<i64: 16, 32>}]} {
    %c0 = arith.constant 0 : index
    %c0_0 = arith.constant 0 : index
    %0 = vector.load %arg1[%c0, %c0_0] : memref<16x32xf32, #tpu.memory_space<vmem>>, vector<16x32xf32>
    %c0_1 = arith.constant 0 : index
    %c0_2 = arith.constant 0 : index
    %1 = vector.load %arg2[%c0_1, %c0_2] : memref<32x96xf32, #tpu.memory_space<vmem>>, vector<32x32xf32>
    %cst = arith.constant dense<0.000000e+00> : vector<16x32xf32>
    %2 = tpu.matmul %0, %1, %cst {dimension_numbers = #tpu.dot_dimension_numbers<[1], [0], [0], [1], [0, 0, 1, 1], [], []>} : vector<16x32xf32>, vector<32x32xf32>, vector<16x32xf32> -> vector<16x32xf32>
    %c0_3 = arith.constant 0 : index
    %c0_4 = arith.constant 0 : index
    %3 = vector.load %arg3[%c0_3, %c0_4] : memref<1x96xf32, #tpu.memory_space<vmem>>, vector<1x32xf32>
    %4 = vector.broadcast %3 : vector<1x32xf32> to vector<16x32xf32>
    %5 = arith.addf %2, %4 : vector<16x32xf32>
    %c0_5 = arith.constant 0 : index
    %c0_6 = arith.constant 0 : index
    %6 = vector.load %arg4[%c0_5, %c0_6] : memref<16x32xf32, #tpu.memory_space<vmem>>, vector<16x32xf32>
    tpu.vector_store %arg4[%c0_5, %c0_6], %5 {strides = array<i32>} : memref<16x32xf32, #tpu.memory_space<vmem>>, vector<16x32xf32>,
    %c0_7 = arith.constant 0 : index
    %c32 = arith.constant 32 : index
    %7 = vector.load %arg2[%c0_7, %c32] : memref<32x96xf32, #tpu.memory_space<vmem>>, vector<32x32xf32>
    %cst_8 = arith.constant dense<0.000000e+00> : vector<16x32xf32>
    %8 = tpu.matmul %0, %7, %cst_8 {dimension_numbers = #tpu.dot_dimension_numbers<[1], [0], [0], [1], [0, 0, 1, 1], [], []>} : vector<16x32xf32>, vector<32x32xf32>, vector<16x32xf32> -> vector<16x32xf32>
    %c0_9 = arith.constant 0 : index
    %c32_10 = arith.constant 32 : index
    %9 = vector.load %arg3[%c0_9, %c32_10] : memref<1x96xf32, #tpu.memory_space<vmem>>, vector<1x32xf32>
    %10 = vector.broadcast %9 : vector<1x32xf32> to vector<16x32xf32>
    %11 = arith.addf %8, %10 : vector<16x32xf32>
    %c0_11 = arith.constant 0 : index
    %c0_12 = arith.constant 0 : index
    %12 = vector.load %arg5[%c0_11, %c0_12] : memref<16x32xf32, #tpu.memory_space<vmem>>, vector<16x32xf32>
    tpu.vector_store %arg5[%c0_11, %c0_12], %11 {strides = array<i32>} : memref<16x32xf32, #tpu.memory_space<vmem>>, vector<16x32xf32>,
    %c0_13 = arith.constant 0 : index
    %c64 = arith.constant 64 : index
    %13 = vector.load %arg2[%c0_13, %c64] : memref<32x96xf32, #tpu.memory_space<vmem>>, vector<32x32xf32>
    %cst_14 = arith.constant dense<0.000000e+00> : vector<16x32xf32>
    %14 = tpu.matmul %0, %13, %cst_14 {dimension_numbers = #tpu.dot_dimension_numbers<[1], [0], [0], [1], [0, 0, 1, 1], [], []>} : vector<16x32xf32>, vector<32x32xf32>, vector<16x32xf32> -> vector<16x32xf32>
    %c0_15 = arith.constant 0 : index
    %c64_16 = arith.constant 64 : index
    %15 = vector.load %arg3[%c0_15, %c64_16] : memref<1x96xf32, #tpu.memory_space<vmem>>, vector<1x32xf32>
    %16 = vector.broadcast %15 : vector<1x32xf32> to vector<16x32xf32>
    %17 = arith.addf %14, %16 : vector<16x32xf32>
    %c0_17 = arith.constant 0 : index
    %c0_18 = arith.constant 0 : index
    %18 = vector.load %arg6[%c0_17, %c0_18] : memref<16x32xf32, #tpu.memory_space<vmem>>, vector<16x32xf32>
    tpu.vector_store %arg6[%c0_17, %c0_18], %17 {strides = array<i32>} : memref<16x32xf32, #tpu.memory_space<vmem>>, vector<16x32xf32>,
    return
  }
  func.func @transform_0(%arg0: i32) -> (i32, i32) {
    %c0_i32 = arith.constant 0 : i32
    %c0_i32_0 = arith.constant 0 : i32
    return %arg0, %c0_i32 : i32, i32
  }
  func.func @transform_1(%arg0: i32) -> (i32, i32) {
    %c0_i32 = arith.constant 0 : i32
    %c0_i32_0 = arith.constant 0 : i32
    %c0_i32_1 = arith.constant 0 : i32
    return %c0_i32, %c0_i32_0 : i32, i32
  }
  func.func @transform_2(%arg0: i32) -> (i32, i32) {
    %c0_i32 = arith.constant 0 : i32
    %c0_i32_0 = arith.constant 0 : i32
    %c0_i32_1 = arith.constant 0 : i32
    return %c0_i32, %c0_i32_0 : i32, i32
  }
  func.func @transform_3(%arg0: i32) -> (i32, i32) {
    %c0_i32 = arith.constant 0 : i32
    %c0_i32_0 = arith.constant 0 : i32
    return %arg0, %c0_i32 : i32, i32
  }
  func.func @transform_4(%arg0: i32) -> (i32, i32) {
    %c0_i32 = arith.constant 0 : i32
    %c0_i32_0 = arith.constant 0 : i32
    return %arg0, %c0_i32 : i32, i32
  }
  func.func @transform_5(%arg0: i32) -> (i32, i32) {
    %c0_i32 = arith.constant 0 : i32
    %c0_i32_0 = arith.constant 0 : i32
    return %arg0, %c0_i32 : i32, i32
  }
}

</mosaic_0001>

<bundles_post_ra>
// kernel: tpu_custom_call.1
= control target key start
LH: loop header
LB: loop body
LE: loop exit
PB: predicated region body
PF: predicated region fallthrough
CT: control target
= control target key end

     0   :  { %7 = vsyncpa [#allocation3], 0  ;;  %s170_s0 = inlined_call_operand.hbm [shape: f32[8,128], index: 0, kind: input, shape index: {}]   ;;  %s171_s1 = inlined_call_operand.hbm [shape: f32[8,128], index: 1, kind: input, shape index: {}]   ;;  %s172_s2 = inlined_call_operand.hbm [shape: f32[8,128], index: 2, kind: output, shape index: {}]  }
   0x1   :  { %8 = vsyncpa [#allocation6], 0 }
   0x2   :  { %9 = vsyncpa [#allocation4], 0  ;;  %s15_s11 = sshll.u32 %s170_s0, 4  ;;  %s143_s12 = smov [#allocation2]   ;;  %s16_s11 = int_to_ptr.hbm [resolvable:$true] %s15_s11 }
   0x3   :  { %s17_s13 = sshll.u32 %s143_s12, 4  ;;  %s26_s16 = sshll.u32 %s171_s1, 4  ;;  %s18_s13 = int_to_ptr.vmem [resolvable:$true] %s17_s13  ;;  %s27_s16 = int_to_ptr.hbm [resolvable:$true] %s26_s16 }
   0x4   :  { %20 = dma.hbm_to_vmem [thread:$0]  %s16_s11, 128, %s18_s13, [#allocation3]  }
   0x5   :  { %s144_s17 = smov [#allocation5]  }
   0x6   :  { %s28_s18 = sshll.u32 %s144_s17, 4  ;;  %s29_s18 = int_to_ptr.vmem [resolvable:$true] %s28_s18 }
   0x7   :  { %31 = dma.hbm_to_vmem [thread:$0]  %s27_s16, 128, %s29_s18, [#allocation6]  }
   0x8   :  { %137 = dma.done.wait [#allocation3], 128  }
   0x9   :  { %138 = vsyncadd [#allocation3], 4294967168 }
   0xa   :  { %139 = dma.done.wait [#allocation6], 128  }
   0xb   :  { %140 = vsyncadd [#allocation6], 4294967168  ;;  %s145_s19 = smov [#allocation7]   ;;  %s51_s22 = sshll.u32 %s172_s2, 4  ;;  %v40_v0 = vld [vmem:[#allocation2] sm:$0xff]  ;;  %v41_v1 = vld [vmem:[#allocation5] sm:$0xff]  ;;  %s52_s22 = int_to_ptr.hbm [resolvable:$true] %s51_s22 }
   0xc   :  { %s49_s0 = sshll.u32 %s145_s19, 4  ;;  %v42_v2 = vadd.f32 %v41_v1, %v40_v0  ;;  %s50_s0 = int_to_ptr.vmem [resolvable:$true] %s49_s0 }
   0xe   :  { %43 = vst [vmem:[#allocation7] sm:$0xff] %v42_v2 }
   0xf   :  { %54 = dma.vmem_to_hbm [thread:$0]  %s50_s0, 128, %s52_s22, [#allocation4]  }
  0x10   :  { %141 = dma.done.wait [#allocation4], 128  }
  0x11   :  { %142 = vsyncadd [#allocation4], 4294967168 }
  0x12   :  { %59 = vsyncpa [#allocation3], 1 }
  0x13   :  { %60 = vsyncpa [#allocation6], 1 }
  0x14   :  { %61 = vsyncpa [#allocation4], 1 }

// kernel: tpu_custom_call.1
= control target key start
LH: loop header
LB: loop body
LE: loop exit
PB: predicated region body
PF: predicated region fallthrough
CT: control target
= control target key end

     0   :  { %11 = vsyncpa [#allocation3], 0  ;;  %s510_s0 = inlined_call_operand.hbm [shape: f32[16,32], index: 0, kind: input, shape index: {}]   ;;  %s511_s1 = inlined_call_operand.hbm [shape: f32[32,96], index: 1, kind: input, shape index: {}]   ;;  %s512_s2 = inlined_call_operand.vmem [shape: f32[1,96], index: 2, kind: input, shape index: {}]   ;;  %s513_s3 = inlined_call_operand.hbm [shape: f32[16,32], index: 3, kind: output, shape index: {0}]   ;;  %s514_s4 = inlined_call_operand.hbm [shape: f32[16,32], index: 4, kind: output, shape index: {1}]   ;;  %s515_s5 = inlined_call_operand.hbm [shape: f32[16,32], index: 5, kind: output, shape index: {2}]  }
   0x1   :  { %12 = vsyncpa [#allocation6], 0 }
   0x2   :  { %13 = vsyncpa [#allocation4], 0 }
   0x3   :  { %14 = vsyncpa [#allocation9], 0  ;;  %s19_s20 = sshll.u32 %s510_s0, 4  ;;  %s420_s21 = smov [#allocation2]   ;;  %s20_s20 = int_to_ptr.hbm [resolvable:$true] %s19_s20 }
   0x4   :  { %s21_s22 = sshll.u32 %s420_s21, 4  ;;  %s32_s25 = sshll.u32 %s511_s1, 4  ;;  %s22_s22 = int_to_ptr.vmem [resolvable:$true] %s21_s22  ;;  %s33_s25 = int_to_ptr.hbm [resolvable:$true] %s32_s25 }
   0x5   :  { %s421_s26 = smov 128   ;;  %s422_s27 = smov 8  }
   0x6   :  { %27 = dma.hbm_to_vmem [thread:$0]  %s20_s20, 256, %s22_s22, [#allocation3], %s421_s26, %s421_s26, %s422_s27  }
   0x7   :  { %s423_s28 = smov [#allocation5]  }
   0x8   :  { %s34_s29 = sshll.u32 %s423_s28, 4  ;;  %s35_s29 = int_to_ptr.vmem [resolvable:$true] %s34_s29 }
   0x9   :  { %40 = dma.hbm_to_vmem [thread:$0]  %s33_s25, 512, %s35_s29, [#allocation6], %s421_s26, %s421_s26, %s422_s27  }
   0xa   :  { %412 = dma.done.wait [#allocation3], 256  }
   0xb   :  { %413 = vsyncadd [#allocation3], 4294967040 }
   0xc   :  { %414 = dma.done.wait [#allocation6], 512  }
   0xd   :  { %415 = vsyncadd [#allocation6], 4294966784  ;;  %v146_v0 = vld [vmem:[#allocation5 + $0x10] sm:$0xff]  ;;  %v147_v1 = vld [vmem:[#allocation5 + $0x18] sm:$0xff]  ;;  %s424_s0 = smov 64   ;;  %s425_s1 = smov 96  }
   0xe   :  { %v269_v2 = vpack.i.bf16 %v146_v0, %v147_v1  ;;  %256 = vmatpush.msra.mxu3 %v147_v1  ;;  %80 = vmatpush.msra.mxu0 %v147_v1  ;;  %v144_v3 = vld [vmem:[#allocation5] sm:$0xff]  ;;  %v145_v4 = vld [vmem:[#allocation5 + $0x8] sm:$0xff]  ;;  %v51_v6 = vld [vmem:[#allocation2] sm:$0xff]  ;;  %vm61_vm0 = vcmask 261120   ;;  %s426_s11 = smov [#allocation7]   ;;  %s201_s15 = sshll.u32 %s513_s3, 4  ;;  %s202_s15 = int_to_ptr.hbm [resolvable:$true] %s201_s15 }
   0xf   :  { %v274_v5 = vpack.i.bf16 %v144_v3, %v145_v4  ;;  %v52_v7 = vld [vmem:[#allocation2 + $0x8] sm:$0xff]  ;;  %v289_v8 = vld [vmem:[%s512_s2] ss:$0 sm:$0xff]  ;;  %s199_s12 = sshll.u32 %s426_s11, 4  ;;  %s214_s18 = sshll.u32 %s514_s4, 4  ;;  %s200_s12 = int_to_ptr.vmem [resolvable:$true] %s199_s12  ;;  %s215_s18 = int_to_ptr.hbm [resolvable:$true] %s214_s18 }
  0x10   :  { %270 = vrot.lane.b32.xlu0 %v269_v2, %s424_s0  ;;  %280 = vrot.lane.b32.xlu1 %v269_v2, %s425_s1  ;;  %v290_v9 = vld [vmem:[%s512_s2] ss:$0 sm:$0xff]  ;;  %s428_s19 = smov [#allocation10]   ;;  %s227_s23 = sshll.u32 %s515_s5, 4  ;;  %s228_s23 = int_to_ptr.hbm [resolvable:$true] %s227_s23 }
  0x11   :  { %257 = vmatpush.msra.mxu3 %v146_v0  ;;  %81 = vmatpush.msra.mxu0 %v146_v0  ;;  %v291_v22 = vld [vmem:[%s512_s2] ss:$0 sm:$0xff]  ;;  %s427_s2 = smov [#allocation8]   ;;  %s225_s20 = sshll.u32 %s428_s19, 4  ;;  %s226_s20 = int_to_ptr.vmem [resolvable:$true] %s225_s20 }
  0x12   :  { %116 = vrot.lane.b32.xlu2 %v289_v8, %s425_s1  ;;  %s212_s3 = sshll.u32 %s427_s2, 4  ;;  %s213_s3 = int_to_ptr.vmem [resolvable:$true] %s212_s3 }
  0x13   :  { %258 = vmatpush.msra.mxu3 %v145_v4  ;;  %82 = vmatpush.msra.mxu0 %v145_v4 }
  0x15   :  { %259 = vmatpush.msra.mxu3 %v144_v3  ;;  %83 = vmatpush.msra.mxu0 %v144_v3 }
  0x16   :  { %250 = vmatmul.msk.f32.vlgmr.msra.gmra.mxu0 %vm61_vm0, %v51_v6  ;;  %251 = vmatmul.msk.f32.vlgmr.msra.gmra.mxu3 %vm61_vm0, %v52_v7 }
  0x18   :  { %275 = vrot.lane.b32.xlu0 %v274_v5, %s424_s0  ;;  %285 = vrot.lane.b32.xlu1 %v274_v5, %s425_s1 }
  0x1a   :  { %167 = vrot.lane.b32.xlu2 %v290_v9, %s424_s0 }
  0x6c   :  { %v117_v27 = vpop.permute.xlu2 %116 }
  0x74   :  { %v168_v30 = vpop.permute.xlu2 %167 }
  0x82   :  { %v271_v10 = vpop.permute.xlu0 %270  ;;  %v281_v11 = vpop.permute.xlu1 %280 }
  0x83   :  { %v272_v12 = vunpack.i.l.bf16 %v271_v10  ;;  %v282_v13 = vunpack.i.l.bf16 %v281_v11  ;;  %v283_v14 = vunpack.i.h.bf16 %v281_v11  ;;  %v273_v15 = vunpack.i.h.bf16 %v271_v10 }
  0x85   :  { %182 = vmatpush.msra.mxu2 %v272_v12  ;;  %131 = vmatpush.msra.mxu1 %v282_v13 }
  0x87   :  { %183 = vmatpush.msra.mxu2 %v273_v15  ;;  %132 = vmatpush.msra.mxu1 %v283_v14 }
  0x8a   :  { %v276_v16 = vpop.permute.xlu0 %275  ;;  %v286_v17 = vpop.permute.xlu1 %285 }
  0x8b   :  { %v277_v18 = vunpack.i.l.bf16 %v276_v16  ;;  %v288_v19 = vunpack.i.h.bf16 %v286_v17  ;;  %v287_v20 = vunpack.i.l.bf16 %v286_v17  ;;  %v278_v21 = vunpack.i.h.bf16 %v276_v16 }
  0x8d   :  { %133 = vmatpush.msra.mxu1 %v287_v20  ;;  %184 = vmatpush.msra.mxu2 %v277_v18 }
  0x8f   :  { %134 = vmatpush.msra.mxu1 %v288_v19  ;;  %185 = vmatpush.msra.mxu2 %v278_v21 }
  0x90   :  { %252 = vmatmul.msk.f32.vlgmr.msra.gmra.mxu1 %vm61_vm0, %v51_v6  ;;  %254 = vmatmul.msk.f32.vlgmr.msra.gmra.mxu2 %vm61_vm0, %v51_v6 }
  0x93   :  { %v85_v23 = vpop.f32.mrf.mxu0 }
  0x94   :  { %v86_v25 = vadd.f32 %v291_v22, %v85_v23 }
  0x96   :  { %91 = vst.msk [vmem:[#allocation7] sm:$0xff] %vm61_vm0, %v86_v25 }
  0x98   :  { %253 = vmatmul.msk.f32.gmra.mxu1 %vm61_vm0, %v52_v7  ;;  %255 = vmatmul.msk.f32.gmra.mxu2 %vm61_vm0, %v52_v7 }
  0x99   :  { %v88_v24 = vpop.f32.mrf.mxu3 }
  0x9a   :  { %v89_v26 = vadd.f32 %v291_v22, %v88_v24 }
  0x9c   :  { %92 = vst.msk [vmem:[#allocation7 + $0x8] sm:$0xff] %vm61_vm0, %v89_v26 }
  0x9d   :  { %207 = dma.vmem_to_hbm [thread:$0]  %s200_s12, 256, %s202_s15, [#allocation4], %s421_s26, %s421_s26, %s422_s27  }
 0x10d   :  { %v136_v28 = vpop.f32.mrf.mxu1 }
 0x10e   :  { %v137_v29 = vadd.f32 %v136_v28, %v117_v27 }
 0x110   :  { %142 = vst.msk [vmem:[#allocation8] sm:$0xff] %vm61_vm0, %v137_v29 }
 0x113   :  { %v187_v31 = vpop.f32.mrf.mxu2 }
 0x114   :  { %v188_v32 = vadd.f32 %v187_v31, %v168_v30 }
 0x115   :  { %v139_v33 = vpop.f32.mrf.mxu1 }
 0x116   :  { %193 = vst.msk [vmem:[#allocation10] sm:$0xff] %vm61_vm0, %v188_v32  ;;  %v140_v34 = vadd.f32 %v139_v33, %v117_v27 }
 0x118   :  { %143 = vst.msk [vmem:[#allocation8 + $0x8] sm:$0xff] %vm61_vm0, %v140_v34 }
 0x119   :  { %220 = dma.vmem_to_hbm [thread:$0]  %s213_s3, 256, %s215_s18, [#allocation9], %s421_s26, %s421_s26, %s422_s27  }
 0x11b   :  { %v190_v35 = vpop.f32.mrf.mxu2 }
 0x11c   :  { %v191_v36 = vadd.f32 %v190_v35, %v168_v30 }
 0x11e   :  { %194 = vst.msk [vmem:[#allocation10 + $0x8] sm:$0xff] %vm61_vm0, %v191_v36 }
 0x11f   :  { %233 = dma.vmem_to_hbm [thread:$0]  %s226_s20, 256, %s228_s23, [#allocation9], %s421_s26, %s421_s26, %s422_s27  }
 0x120   :  { %416 = dma.done.wait [#allocation4], 256  }
 0x121   :  { %417 = vsyncadd [#allocation4], 4294967040 }
 0x122   :  { %418 = dma.done.wait [#allocation9], 512  }
 0x123   :  { %419 = vsyncadd [#allocation9], 4294966784 }
 0x124   :  { %246 = vsyncpa [#allocation3], 1 }
 0x125   :  { %247 = vsyncpa [#allocation6], 1 }
 0x126   :  { %248 = vsyncpa [#allocation4], 1 }
 0x127   :  { %249 = vsyncpa [#allocation9], 1 }

</bundles_post_ra>
